<compile_context>
chip_gen: v7x
topology: tpu7x:2x2x1
jax: 0.10.0
libtpu: 0.0.40
codegen_flags: <defaults>
</compile_context>

<pallas_src>
import math
import functools

import jax
import jax.numpy as jnp
from jax import lax
from jax.experimental import pallas as pl
from jax.experimental.pallas import tpu as pltpu

_TINY_BYTES = 64 * 1024          # below this, skip the custom call entirely
_DEFAULT_BLOCK_BYTES = 4 << 20   # v5e / v6e
_V7X_BLOCK_BYTES = 8 << 20       # v7x (64 MiB physical VMEM, much higher HBM BW)


def _reference(x: jax.Array, kind: str) -> jax.Array:
    """Plain-jnp semantics of the PyTorch module (used for tiny tensors / tails)."""
    if kind == "relu":
        return jnp.maximum(x, 0).astype(x.dtype)
    xf = x.astype(jnp.float32)
    y = xf * 0.5 * (1.0 + lax.erf(xf * (1.0 / math.sqrt(2.0))))
    return y.astype(x.dtype)


def _activate_kernel(x_ref, o_ref, *, activate_fun: str):
    x = x_ref[...]
    if activate_fun == "relu":
        o_ref[...] = jnp.maximum(x, 0).astype(o_ref.dtype)
    else:  # exact erf-based GELU, matching torch: x * 0.5 * (1 + erf(x/sqrt(2)))
        xf = x.astype(jnp.float32)
        y = xf * 0.5 * (1.0 + lax.erf(xf * (1.0 / math.sqrt(2.0))))
        o_ref[...] = y.astype(o_ref.dtype)


def _pick_block_bytes() -> int:
    """Per-generation block byte budget (bigger blocks amortize step overhead)."""
    try:
        info = pltpu.get_tpu_info()
        vmem = getattr(info, "vmem_capacity_bytes", None)
        if vmem is not None and vmem <= (64 << 20):   # v7x-class: 64 MiB VMEM/TC
            return _V7X_BLOCK_BYTES
    except Exception:
        pass
    return _DEFAULT_BLOCK_BYTES


def _block_rows(width: int, itemsize: int, block_bytes: int) -> int:
    """Rows per block for a byte budget, rounded to the dtype's sublane packing."""
    packing = max(8, 32 // itemsize)        # 8 (f32), 16 (bf16), 32 (int8/fp8)
    rows = max(1, block_bytes // (width * itemsize))
    rows = max(packing, (rows // packing) * packing)
    return rows


def _run_slab(x2d: jax.Array, kind: str, tile_rows: int, block_bytes: int) -> jax.Array:
    rows, width = x2d.shape
    kernel = functools.partial(_activate_kernel, activate_fun=kind)
    # 2 inputs-deep + 2 outputs-deep double buffering plus headroom.
    vmem_limit = min(48 << 20, 4 * block_bytes + (16 << 20))
    return pl.pallas_call(
        kernel,
        out_shape=jax.ShapeDtypeStruct((rows, width), x2d.dtype),
        grid=(pl.cdiv(rows, tile_rows),),            # partial last block is masked
        in_specs=[pl.BlockSpec((tile_rows, width), lambda i: (i, 0))],
        out_specs=pl.BlockSpec((tile_rows, width), lambda i: (i, 0)),
        compiler_params=pltpu.CompilerParams(
            dimension_semantics=("parallel",),       # independent tiles -> both TCs on v7x
            vmem_limit_bytes=vmem_limit,
        ),
    )(x2d)


def activate_fun(x: jax.Array, kind: str = "gelu", *, block_bytes: int | None = None) -> jax.Array:
    """Pallas implementation of ActivateFun.forward (relu / gelu)."""
    if kind not in ("relu", "gelu"):
        # PyTorch module silently returns None for unknown activations; raising
        # at trace time is the only sane equivalent here.
        raise ValueError(f"Unsupported activate_fun: {kind!r} (expected 'relu' or 'gelu')")

    orig_shape = x.shape
    total = int(math.prod(orig_shape)) if orig_shape else 1
    itemsize = jnp.dtype(x.dtype).itemsize

    if total == 0 or total * itemsize < _TINY_BYTES:
        # Custom-call + single-step overhead dominates tiny activations; let XLA fuse.
        return _reference(x, kind)

    # Widest lane-dense factorization that divides total exactly (no pad/copy).
    if total % 1024 == 0:
        width = 1024
    else:
        width = 128
    bulk = (total // width) * width            # == total unless total % 128 != 0
    rows = bulk // width

    if block_bytes is None:
        block_bytes = _pick_block_bytes()
    tile_rows = min(_block_rows(width, itemsize, block_bytes), rows)

    flat = x.reshape(-1)                       # contiguous -> free reshape
    if bulk == total:
        out_flat = _run_slab(flat.reshape(rows, width), kind, tile_rows, block_bytes).reshape(-1)
    else:
        # Ragged total: bulk through the kernel, <width-element tail via plain jnp.
        # TODO(synk): the final concatenate still rewrites the output buffer; a
        # manual-DMA (pl.ANY) variant could remove it if ragged shapes mattered.
        out_bulk = _run_slab(flat[:bulk].reshape(rows, width), kind, tile_rows, block_bytes)
        out_tail = _reference(flat[bulk:], kind)
        out_flat = jnp.concatenate([out_bulk.reshape(-1), out_tail])

    return out_flat.reshape(orig_shape)


if __name__ == "__main__":
    key = jax.random.PRNGKey(0)
    k1, k2, k3, k4, k5 = jax.random.split(key, 5)

    def gelu_ref(v):
        vf = v.astype(jnp.float32)
        return (vf * 0.5 * (1.0 + lax.erf(vf / math.sqrt(2.0)))).astype(v.dtype)

    # 1) Main Pallas path: 2x4x64x64 f32 = 128 KiB, total % 1024 == 0 -> single slab.
    x = jax.random.normal(k1, (2, 4, 64, 64), dtype=jnp.float32)
    y_gelu = jax.block_until_ready(activate_fun(x, "gelu"))
    assert y_gelu.shape == x.shape
    assert jnp.allclose(y_gelu, gelu_ref(x), atol=1e-5, rtol=1e-5)

    y_relu = jax.block_until_ready(activate_fun(x, "relu"))
    assert jnp.allclose(y_relu, jnp.maximum(x, 0.0))

    # 2) Multi-block grid with a masked partial last block (forced small block budget).
    x_pb = jax.random.normal(k2, (2, 4, 80, 64), dtype=jnp.float32)   # 40 rows of 1024
    y_pb = jax.block_until_ready(activate_fun(x_pb, "gelu", block_bytes=64 * 1024))
    assert jnp.allclose(y_pb, gelu_ref(x_pb), atol=1e-5, rtol=1e-5)

    # 3) Ragged total (not a multiple of 128): bulk kernel + tiny jnp tail.
    x_odd = jax.random.normal(k3, (3, 5, 33, 41), dtype=jnp.float32)
    y_odd = jax.block_until_ready(activate_fun(x_odd, "gelu"))
    assert y_odd.shape == x_odd.shape
    assert jnp.allclose(y_odd, gelu_ref(x_odd), atol=1e-5, rtol=1e-5)

    # 4) bf16 path (sublane-packed dtype; f32 compute inside the kernel).
    x_bf = jax.random.normal(k4, (2, 4, 128, 128), dtype=jnp.bfloat16)
    y_bf = jax.block_until_ready(activate_fun(x_bf, "gelu"))
    assert jnp.allclose(y_bf.astype(jnp.float32), gelu_ref(x_bf).astype(jnp.float32),
                        atol=2e-2, rtol=2e-2)

    # 5) Tiny tensor: short-circuits to plain jnp (no custom call), still correct.
    x_tiny = jax.random.normal(k5, (2, 4, 16, 16), dtype=jnp.float32)
    y_tiny = jax.block_until_ready(activate_fun(x_tiny, "relu"))
    assert jnp.allclose(y_tiny, jnp.maximum(x_tiny, 0.0))

    print("KERNEL_OK")
</pallas_src>

<mosaic_0001>
module attributes {stable_mosaic.version = 11 : i64} {
  func.func @_activate_kernel(%arg0: i32, %arg1: memref<32x1024xf32, #tpu.memory_space<vmem>>, %arg2: memref<32x1024xf32, #tpu.memory_space<vmem>>) attributes {dimension_semantics = [#tpu.dimension_semantics<parallel>], iteration_bounds = array<i64: 1>, scalar_prefetch = 0 : i64, scratch_operands = 0 : i64, tpu.core_type = #tpu.core_type<tc>, window_params = [{transform_indices = @transform_0, window_bounds = array<i64: 32, 1024>}, {transform_indices = @transform_1, window_bounds = array<i64: 32, 1024>}]} {
    %c0 = arith.constant 0 : index
    %c0_0 = arith.constant 0 : index
    %0 = vector.load %arg1[%c0, %c0_0] : memref<32x1024xf32, #tpu.memory_space<vmem>>, vector<32x1024xf32>
    %cst = arith.constant 5.000000e-01 : f32
    %1 = vector.broadcast %cst : f32 to vector<32x1024xf32>
    %2 = arith.mulf %0, %1 : vector<32x1024xf32>
    %cst_1 = arith.constant 0.707106769 : f32
    %3 = vector.broadcast %cst_1 : f32 to vector<32x1024xf32>
    %4 = arith.mulf %0, %3 : vector<32x1024xf32>
    %5 = math.erf %4 : vector<32x1024xf32>
    %cst_2 = arith.constant 1.000000e+00 : f32
    %6 = vector.broadcast %cst_2 : f32 to vector<32x1024xf32>
    %7 = arith.addf %6, %5 : vector<32x1024xf32>
    %8 = arith.mulf %2, %7 : vector<32x1024xf32>
    %c0_3 = arith.constant 0 : index
    %c0_4 = arith.constant 0 : index
    %9 = vector.load %arg2[%c0_3, %c0_4] : memref<32x1024xf32, #tpu.memory_space<vmem>>, vector<32x1024xf32>
    tpu.vector_store %arg2[%c0_3, %c0_4], %8 {strides = array<i32>} : memref<32x1024xf32, #tpu.memory_space<vmem>>, vector<32x1024xf32>,
    return
  }
  func.func @transform_0(%arg0: i32) -> (i32, i32) {
    %c0_i32 = arith.constant 0 : i32
    %c0_i32_0 = arith.constant 0 : i32
    return %arg0, %c0_i32 : i32, i32
  }
  func.func @transform_1(%arg0: i32) -> (i32, i32) {
    %c0_i32 = arith.constant 0 : i32
    %c0_i32_0 = arith.constant 0 : i32
    return %arg0, %c0_i32 : i32, i32
  }
}

</mosaic_0001>

<bundles_post_ra>
// kernel: tpu_custom_call.1
= control target key start
LH: loop header
LB: loop body
LE: loop exit
PB: predicated region body
PF: predicated region fallthrough
CT: control target
= control target key end

     0   :  { %6 = vsyncpa [#allocation3], 0  ;;  %s526_s0 = inlined_call_operand.hbm [shape: f32[32,1024], index: 0, kind: input, shape index: {}]   ;;  %s527_s1 = inlined_call_operand.hbm [shape: f32[32,1024], index: 1, kind: output, shape index: {}]  }
   0x1   :  { %7 = vsyncpa [#allocation4], 0  ;;  %s380_s6 = smov [#allocation2]   ;;  %s332_s10 = scalar_lea.hbm %s526_s0, 4096 }
   0x2   :  { %s13_s7 = sshll.u32 %s380_s6, 4  ;;  %p333_p0 = scmp.ne.s32.totalorder %s526_s0, %s332_s10  ;;  %s14_s7 = int_to_ptr.vmem [resolvable:$true] %s13_s7 }
   0x3   :  { %p336_p1 = scmp.lt.u32.totalorder %s332_s10, %s526_s0 }
   0x5   :  { %p338_p2 = pnand %p336_p1, %p333_p0 }
   0x7   :  { %341 = shalt.err (!%p338_p2)
}
   0x8   :  { %s342_s15 = scalar_lea.vmem %s14_s7, 4096  ;;  %p347_p4 = scmp.lt.s32.totalorder %s14_s7, %s14_s7 }
   0x9   :  { %p343_p3 = scmp.ne.s32.totalorder %s14_s7, %s342_s15  ;;  %p348_p5 = scmp.lt.s32.totalorder %s342_s15, %s342_s15 }
   0xb   :  { %p349_p6 = por %p348_p5, %p347_p4 }
   0xd   :  { %p350_p7 = pnand %p349_p6, %p343_p3 }
   0xf   :  { %353 = shalt.err (!%p350_p7)
}
  0x10   :  { %s381_s16 = smov 1024   ;;  %s382_s17 = smov 64  }
  0x11   :  { %19 = dma.hbm_to_vmem [thread:$0]  %s526_s0, 4096, %s14_s7, [#allocation3], %s381_s16, %s381_s16, %s382_s17  }
  0x12   :  { %376 = dma.done.wait [#allocation3], 4096  }
  0x13   :  { %377 = vsyncadd [#allocation3], 4294963200  ;;  %v23_v0 = vld [vmem:[#allocation2] sm:$0xff]  ;;  %v24_v1 = vld [vmem:[#allocation2 + $0x8] sm:$0xff]  ;;  %s383_s0 = smov [#allocation5]  }
  0x14   :  { %v25_v2 = vld [vmem:[#allocation2 + $0x10] sm:$0xff]  ;;  %v87_v3 = vmul.f32 0.70710677, %v23_v0  ;;  %v88_v4 = vmul.f32 0.70710677, %v24_v1  ;;  %v26_v6 = vld [vmem:[#allocation2 + $0x18] sm:$0xff] }
  0x15   :  { %v89_v5 = vmul.f32 0.70710677, %v25_v2  ;;  %v27_v7 = vld [vmem:[#allocation2 + $0x20] sm:$0xff]  ;;  %v28_v8 = vld [vmem:[#allocation2 + $0x28] sm:$0xff]  ;;  %v90_v9 = vmul.f32 0.70710677, %v26_v6 }
  0x16   :  { %268 = verf.f32 %v87_v3  ;;  %v29_v10 = vld [vmem:[#allocation2 + $0x30] sm:$0xff]  ;;  %v30_v11 = vld [vmem:[#allocation2 + $0x38] sm:$0xff]  ;;  %v91_v12 = vmul.f32 0.70710677, %v27_v7  ;;  %v92_v13 = vmul.f32 0.70710677, %v28_v8 }
  0x17   :  { %270 = verf.f32 %v88_v4  ;;  %v31_v14 = vld [vmem:[#allocation2 + $0x40] sm:$0xff]  ;;  %v93_v15 = vmul.f32 0.70710677, %v29_v10  ;;  %v32_v16 = vld [vmem:[#allocation2 + $0x48] sm:$0xff]  ;;  %v55_v17 = vmul.f32 0.5, %v23_v0  ;;  %v33_v19 = vld [vmem:[#allocation2 + $0x50] sm:$0xff] }
  0x18   :  { %272 = verf.f32 %v89_v5  ;;  %v94_v18 = vmul.f32 0.70710677, %v30_v11  ;;  %v56_v20 = vmul.f32 0.5, %v24_v1  ;;  %v57_v21 = vmul.f32 0.5, %v25_v2  ;;  %v34_v23 = vld [vmem:[#allocation2 + $0x58] sm:$0xff]  ;;  %v35_v27 = vld [vmem:[#allocation2 + $0x60] sm:$0xff] }
  0x19   :  { %274 = verf.f32 %v90_v9  ;;  %v95_v22 = vmul.f32 0.70710677, %v31_v14  ;;  %v409_v24 = vmul.f32 0.5, %v26_v6  ;;  %v411_v25 = vmul.f32 0.5, %v27_v7  ;;  %v36_v31 = vld [vmem:[#allocation2 + $0x68] sm:$0xff]  ;;  %v37_v35 = vld [vmem:[#allocation2 + $0x70] sm:$0xff] }
  0x1a   :  { %276 = verf.f32 %v91_v12  ;;  %v96_v26 = vmul.f32 0.70710677, %v32_v16  ;;  %v413_v28 = vmul.f32 0.5, %v28_v8  ;;  %v415_v29 = vmul.f32 0.5, %v29_v10  ;;  %v38_v39 = vld [vmem:[#allocation2 + $0x78] sm:$0xff]  ;;  %v39_v43 = vld [vmem:[#allocation2 + $0x80] sm:$0xff] }
  0x1b   :  { %278 = verf.f32 %v92_v13  ;;  %v97_v30 = vmul.f32 0.70710677, %v33_v19  ;;  %v417_v32 = vmul.f32 0.5, %v30_v11  ;;  %v419_v33 = vmul.f32 0.5, %v31_v14  ;;  %v433_v48 = vld [vmem:[#allocation2 + $0x88] sm:$0xff]  ;;  %v437_v53 = vld [vmem:[#allocation2 + $0x90] sm:$0xff] }
  0x1c   :  { %280 = verf.f32 %v93_v15  ;;  %v98_v34 = vmul.f32 0.70710677, %v34_v23  ;;  %v421_v36 = vmul.f32 0.5, %v32_v16  ;;  %v423_v37 = vmul.f32 0.5, %v33_v19  ;;  %v441_v58 = vld [vmem:[#allocation2 + $0x98] sm:$0xff]  ;;  %v444_v63 = vld [vmem:[#allocation2 + $0xa0] sm:$0xff] }
  0x1d   :  { %282 = verf.f32 %v94_v18  ;;  %v99_v38 = vmul.f32 0.70710677, %v35_v27  ;;  %v425_v40 = vmul.f32 0.5, %v34_v23  ;;  %v427_v41 = vmul.f32 0.5, %v35_v27  ;;  %v447_v4 = vld [vmem:[#allocation2 + $0xa8] sm:$0xff]  ;;  %v450_v9 = vld [vmem:[#allocation2 + $0xb0] sm:$0xff] }
  0x1e   :  { %284 = verf.f32 %v95_v22  ;;  %v100_v42 = vmul.f32 0.70710677, %v36_v31  ;;  %v429_v45 = vmul.f32 0.5, %v36_v31  ;;  %v431_v46 = vmul.f32 0.5, %v37_v35  ;;  %v454_v14 = vld [vmem:[#allocation2 + $0xb8] sm:$0xff]  ;;  %v458_v19 = vld [vmem:[#allocation2 + $0xc0] sm:$0xff] }
  0x1f   :  { %286 = verf.f32 %v96_v26  ;;  %v101_v47 = vmul.f32 0.70710677, %v37_v35  ;;  %v435_v51 = vmul.f32 0.5, %v38_v39  ;;  %v102_v52 = vmul.f32 0.70710677, %v38_v39  ;;  %s252_s20 = sshll.u32 %s383_s0, 4  ;;  %s253_s20 = int_to_ptr.vmem [resolvable:$true] %s252_s20 }
  0x20   :  { %v269_v44 = vpop.eup %268  ;;  %288 = verf.f32 %v97_v30  ;;  %v439_v56 = vmul.f32 0.5, %v39_v43  ;;  %v103_v57 = vmul.f32 0.70710677, %v39_v43  ;;  %v104_v62 = vmul.f32 0.70710677, %v433_v48  ;;  %s354_s21 = scalar_lea.vmem %s253_s20, 4096  ;;  %p359_p9 = scmp.lt.s32.totalorder %s253_s20, %s253_s20 }
  0x21   :  { %v271_v49 = vpop.eup %270  ;;  %v151_v50 = vadd.f32 1.0, %v269_v44  ;;  %290 = verf.f32 %v98_v34  ;;  %v105_v3 = vmul.f32 0.70710677, %v437_v53  ;;  %v106_v8 = vmul.f32 0.70710677, %v441_v58  ;;  %p355_p8 = scmp.ne.s32.totalorder %s253_s20, %s354_s21  ;;  %p360_p10 = scmp.lt.s32.totalorder %s354_s21, %s354_s21 }
  0x22   :  { %v273_v54 = vpop.eup %272  ;;  %v152_v55 = vadd.f32 1.0, %v271_v49  ;;  %292 = verf.f32 %v99_v38  ;;  %v107_v13 = vmul.f32 0.70710677, %v444_v63  ;;  %v108_v18 = vmul.f32 0.70710677, %v447_v4  ;;  %v468_v38 = vld [vmem:[#allocation2 + $0xd0] sm:$0xff] }
  0x23   :  { %v275_v59 = vpop.eup %274  ;;  %v183_v60 = vmul.f32 %v151_v50, %v55_v17  ;;  %v153_v61 = vadd.f32 1.0, %v273_v54  ;;  %294 = verf.f32 %v100_v42  ;;  %v109_v23 = vmul.f32 0.70710677, %v450_v9  ;;  %v474_v50 = vld [vmem:[#allocation2 + $0xd8] sm:$0xff]  ;;  %p361_p11 = por %p360_p10, %p359_p9 }
  0x24   :  { %v277_v0 = vpop.eup %276  ;;  %v184_v1 = vmul.f32 %v152_v55, %v56_v20  ;;  %v154_v2 = vadd.f32 1.0, %v275_v59  ;;  %296 = verf.f32 %v101_v47  ;;  %v110_v30 = vmul.f32 0.70710677, %v454_v14 }
  0x25   :  { %v279_v5 = vpop.eup %278  ;;  %215 = vst [vmem:[#allocation5] sm:$0xff] %v183_v60  ;;  %v185_v6 = vmul.f32 %v153_v61, %v57_v21  ;;  %v155_v7 = vadd.f32 1.0, %v277_v0  ;;  %298 = verf.f32 %v102_v52  ;;  %p362_p12 = pnand %p361_p11, %p355_p8 }
  0x26   :  { %v281_v10 = vpop.eup %280  ;;  %216 = vst [vmem:[#allocation5 + $0x8] sm:$0xff] %v184_v1  ;;  %v186_v11 = vmul.f32 %v154_v2, %v409_v24  ;;  %v156_v12 = vadd.f32 1.0, %v279_v5  ;;  %300 = verf.f32 %v103_v57  ;;  %v462_v24 = vld [vmem:[#allocation2 + $0xc8] sm:$0xff] }
  0x27   :  { %v283_v15 = vpop.eup %282  ;;  %217 = vst [vmem:[#allocation5 + $0x10] sm:$0xff] %v185_v6  ;;  %v187_v16 = vmul.f32 %v155_v7, %v411_v25  ;;  %v157_v17 = vadd.f32 1.0, %v281_v10  ;;  %302 = verf.f32 %v104_v62  ;;  %v484_v1 = vld [vmem:[#allocation2 + $0xe8] sm:$0xff] }
  0x28   :  { %v285_v20 = vpop.eup %284  ;;  %218 = vst [vmem:[#allocation5 + $0x18] sm:$0xff] %v186_v11  ;;  %v188_v21 = vmul.f32 %v156_v12, %v413_v28  ;;  %v158_v22 = vadd.f32 1.0, %v283_v15  ;;  %304 = verf.f32 %v105_v3  ;;  %v111_v28 = vmul.f32 0.70710677, %v458_v19 }
  0x29   :  { %v287_v26 = vpop.eup %286  ;;  %219 = vst [vmem:[#allocation5 + $0x20] sm:$0xff] %v187_v16  ;;  %v189_v25 = vmul.f32 %v157_v17, %v415_v29  ;;  %v159_v27 = vadd.f32 1.0, %v285_v20  ;;  %306 = verf.f32 %v106_v8  ;;  %v112_v29 = vmul.f32 0.70710677, %v462_v24  ;;  %v490_v8 = vld [vmem:[#allocation2 + $0xf0] sm:$0xff] }
  0x2a   :  { %v289_v31 = vpop.eup %288  ;;  %220 = vst [vmem:[#allocation5 + $0x28] sm:$0xff] %v188_v21  ;;  %v190_v34 = vmul.f32 %v158_v22, %v417_v32  ;;  %v160_v35 = vadd.f32 1.0, %v287_v26  ;;  %308 = verf.f32 %v107_v13  ;;  %v72_v32 = vmul.f32 0.5, %v433_v48  ;;  %v480_v48 = vld [vmem:[#allocation2 + $0xe0] sm:$0xff]  ;;  %v495_v13 = vld [vmem:[#allocation2 + $0xf8] sm:$0xff] }
  0x2b   :  { %v291_v39 = vpop.eup %290  ;;  %221 = vst [vmem:[#allocation5 + $0x30] sm:$0xff] %v189_v25  ;;  %v191_v42 = vmul.f32 %v159_v27, %v419_v33  ;;  %v161_v43 = vadd.f32 1.0, %v289_v31  ;;  %310 = verf.f32 %v108_v18  ;;  %v113_v33 = vmul.f32 0.70710677, %v468_v38 }
  0x2c   :  { %v293_v44 = vpop.eup %292  ;;  %222 = vst [vmem:[#allocation5 + $0x38] sm:$0xff] %v190_v34  ;;  %v192_v47 = vmul.f32 %v160_v35, %v421_v36  ;;  %v162_v49 = vadd.f32 1.0, %v291_v39  ;;  %312 = verf.f32 %v109_v23  ;;  %v73_v36 = vmul.f32 0.5, %v437_v53 }
  0x2d   :  { %v295_v52 = vpop.eup %294  ;;  %223 = vst [vmem:[#allocation5 + $0x40] sm:$0xff] %v191_v42  ;;  %v193_v54 = vmul.f32 %v161_v43, %v423_v37  ;;  %v163_v55 = vadd.f32 1.0, %v293_v44  ;;  %314 = verf.f32 %v110_v30  ;;  %v114_v37 = vmul.f32 0.70710677, %v474_v50 }
  0x2e   :  { %v297_v57 = vpop.eup %296  ;;  %224 = vst [vmem:[#allocation5 + $0x48] sm:$0xff] %v192_v47  ;;  %v194_v59 = vmul.f32 %v162_v49, %v425_v40  ;;  %v164_v60 = vadd.f32 1.0, %v295_v52  ;;  %316 = verf.f32 %v111_v28  ;;  %v74_v53 = vmul.f32 0.5, %v441_v58 }
  0x2f   :  { %v299_v61 = vpop.eup %298  ;;  %225 = vst [vmem:[#allocation5 + $0x50] sm:$0xff] %v193_v54  ;;  %v195_v62 = vmul.f32 %v163_v55, %v427_v41  ;;  %v165_v0 = vadd.f32 1.0, %v297_v57  ;;  %318 = verf.f32 %v112_v29  ;;  %v115_v41 = vmul.f32 0.70710677, %v480_v48 }
  0x30   :  { %v301_v2 = vpop.eup %300  ;;  %226 = vst [vmem:[#allocation5 + $0x58] sm:$0xff] %v194_v59  ;;  %v196_v40 = vmul.f32 %v164_v60, %v429_v45  ;;  %v166_v3 = vadd.f32 1.0, %v299_v61  ;;  %320 = verf.f32 %v113_v33  ;;  %v75_v45 = vmul.f32 0.5, %v444_v63 }
  0x31   :  { %v303_v5 = vpop.eup %302  ;;  %227 = vst [vmem:[#allocation5 + $0x60] sm:$0xff] %v195_v62  ;;  %v197_v6 = vmul.f32 %v165_v0, %v431_v46  ;;  %v167_v7 = vadd.f32 1.0, %v301_v2  ;;  %322 = verf.f32 %v114_v37  ;;  %v116_v58 = vmul.f32 0.70710677, %v484_v1 }
  0x32   :  { %v305_v10 = vpop.eup %304  ;;  %228 = vst [vmem:[#allocation5 + $0x68] sm:$0xff] %v196_v40  ;;  %v198_v11 = vmul.f32 %v166_v3, %v435_v51  ;;  %v168_v12 = vadd.f32 1.0, %v303_v5  ;;  %v76_v17 = vmul.f32 0.5, %v447_v4  ;;  %324 = verf.f32 %v115_v41 }
  0x33   :  { %v307_v15 = vpop.eup %306  ;;  %229 = vst [vmem:[#allocation5 + $0x70] sm:$0xff] %v197_v6  ;;  %v199_v46 = vmul.f32 %v167_v7, %v439_v56  ;;  %v169_v16 = vadd.f32 1.0, %v305_v10  ;;  %326 = verf.f32 %v116_v58  ;;  %v117_v51 = vmul.f32 0.70710677, %v490_v8 }
  0x34   :  { %v309_v18 = vpop.eup %308  ;;  %230 = vst [vmem:[#allocation5 + $0x78] sm:$0xff] %v198_v11  ;;  %v200_v20 = vmul.f32 %v168_v12, %v72_v32  ;;  %v170_v21 = vadd.f32 1.0, %v307_v15  ;;  %v77_v26 = vmul.f32 0.5, %v450_v9  ;;  %v118_v25 = vmul.f32 0.70710677, %v495_v13 }
  0x35   :  { %v311_v63 = vpop.eup %310  ;;  %231 = vst [vmem:[#allocation5 + $0x80] sm:$0xff] %v199_v46  ;;  %v201_v22 = vmul.f32 %v169_v16, %v73_v36  ;;  %v171_v23 = vadd.f32 1.0, %v309_v18  ;;  %v78_v30 = vmul.f32 0.5, %v454_v14  ;;  %328 = verf.f32 %v117_v51 }
  0x36   :  { %v313_v56 = vpop.eup %312  ;;  %232 = vst [vmem:[#allocation5 + $0x88] sm:$0xff] %v200_v20  ;;  %v202_v27 = vmul.f32 %v170_v21, %v74_v53  ;;  %v172_v4 = vadd.f32 1.0, %v311_v63  ;;  %v79_v28 = vmul.f32 0.5, %v458_v19  ;;  %330 = verf.f32 %v118_v25 }
  0x37   :  { %v315_v31 = vpop.eup %314  ;;  %233 = vst [vmem:[#allocation5 + $0x90] sm:$0xff] %v201_v22  ;;  %v203_v34 = vmul.f32 %v171_v23, %v75_v45  ;;  %v173_v35 = vadd.f32 1.0, %v313_v56  ;;  %v80_v43 = vmul.f32 0.5, %v462_v24  ;;  %v81_v14 = vmul.f32 0.5, %v468_v38 }
  0x38   :  { %v317_v39 = vpop.eup %316  ;;  %234 = vst [vmem:[#allocation5 + $0x98] sm:$0xff] %v202_v27  ;;  %v204_v42 = vmul.f32 %v172_v4, %v76_v17  ;;  %v174_v9 = vadd.f32 1.0, %v315_v31  ;;  %v82_v54 = vmul.f32 0.5, %v474_v50  ;;  %v83_v24 = vmul.f32 0.5, %v480_v48 }
  0x39   :  { %v319_v29 = vpop.eup %318  ;;  %235 = vst [vmem:[#allocation5 + $0xa0] sm:$0xff] %v203_v34  ;;  %v205_v44 = vmul.f32 %v173_v35, %v77_v26  ;;  %v175_v47 = vadd.f32 1.0, %v317_v39  ;;  %v84_v38 = vmul.f32 0.5, %v484_v1  ;;  %v85_v37 = vmul.f32 0.5, %v490_v8 }
  0x3a   :  { %v321_v49 = vpop.eup %320  ;;  %236 = vst [vmem:[#allocation5 + $0xa8] sm:$0xff] %v204_v42  ;;  %v206_v32 = vmul.f32 %v174_v9, %v78_v30  ;;  %v176_v52 = vadd.f32 1.0, %v319_v29  ;;  %v86_v3 = vmul.f32 0.5, %v495_v13 }
  0x3b   :  { %v323_v19 = vpop.eup %322  ;;  %237 = vst [vmem:[#allocation5 + $0xb0] sm:$0xff] %v205_v44  ;;  %v207_v55 = vmul.f32 %v175_v47, %v79_v28  ;;  %v177_v33 = vadd.f32 1.0, %v321_v49 }
  0x3c   :  { %238 = vst [vmem:[#allocation5 + $0xb8] sm:$0xff] %v206_v32  ;;  %v208_v57 = vmul.f32 %v176_v52, %v80_v43  ;;  %v178_v59 = vadd.f32 1.0, %v323_v19  ;;  %v325_v60 = vpop.eup %324 }
  0x3d   :  { %239 = vst [vmem:[#allocation5 + $0xc0] sm:$0xff] %v207_v55  ;;  %v209_v36 = vmul.f32 %v177_v33, %v81_v14  ;;  %v327_v61 = vpop.eup %326  ;;  %v179_v0 = vadd.f32 1.0, %v325_v60 }
  0x3e   :  { %240 = vst [vmem:[#allocation5 + $0xc8] sm:$0xff] %v208_v57  ;;  %v210_v62 = vmul.f32 %v178_v59, %v82_v54  ;;  %v180_v50 = vadd.f32 1.0, %v327_v61 }
  0x3f   :  { %241 = vst [vmem:[#allocation5 + $0xd0] sm:$0xff] %v209_v36  ;;  %v329_v2 = vpop.eup %328  ;;  %v211_v40 = vmul.f32 %v179_v0, %v83_v24 }
  0x40   :  { %242 = vst [vmem:[#allocation5 + $0xd8] sm:$0xff] %v210_v62  ;;  %v331_v53 = vpop.eup %330  ;;  %v212_v48 = vmul.f32 %v180_v50, %v84_v38  ;;  %v181_v5 = vadd.f32 1.0, %v329_v2 }
  0x41   :  { %243 = vst [vmem:[#allocation5 + $0xe0] sm:$0xff] %v211_v40  ;;  %v182_v1 = vadd.f32 1.0, %v331_v53 }
  0x42   :  { %244 = vst [vmem:[#allocation5 + $0xe8] sm:$0xff] %v212_v48  ;;  %v213_v6 = vmul.f32 %v181_v5, %v85_v37 }
  0x43   :  { %v214_v7 = vmul.f32 %v182_v1, %v86_v3 }
  0x44   :  { %245 = vst [vmem:[#allocation5 + $0xf0] sm:$0xff] %v213_v6 }
  0x45   :  { %246 = vst [vmem:[#allocation5 + $0xf8] sm:$0xff] %v214_v7 }
  0x46   :  { %365 = shalt.err (!%p362_p12)
}
  0x47   :  { %s366_s24 = scalar_lea.hbm %s527_s1, 4096 }
  0x48   :  { %p367_p13 = scmp.ne.s32.totalorder %s527_s1, %s366_s24  ;;  %p370_p0 = scmp.lt.u32.totalorder %s366_s24, %s527_s1 }
  0x4a   :  { %p372_p1 = pnand %p370_p0, %p367_p13 }
  0x4c   :  { %375 = shalt.err (!%p372_p1)
}
  0x4d   :  { %258 = dma.vmem_to_hbm [thread:$0]  %s253_s20, 4096, %s527_s1, [#allocation4], %s381_s16, %s381_s16, %s382_s17  }
  0x4e   :  { %378 = dma.done.wait [#allocation4], 4096  }
  0x4f   :  { %379 = vsyncadd [#allocation4], 4294963200 }
  0x50   :  { %262 = vsyncpa [#allocation3], 1 }
  0x51   :  { %263 = vsyncpa [#allocation4], 1 }

</bundles_post_ra>
